<compile_context>
chip_gen: v7x
topology: tpu7x:2x2x1
jax: 0.10.0
libtpu: 0.0.40
codegen_flags: <defaults>
</compile_context>

<pallas_src>
import functools
import jax
import jax.numpy as jnp
from jax.experimental import pallas as pl
from jax.experimental.pallas import tpu as pltpu


# Set True to feed the MXU bf16 inputs (f32 accumulation): ~2-4x matmul
# throughput on v5e/v6e/v7x at the cost of slight drift vs the f32 reference.
USE_BF16_MATMUL = False


def _mm_in(x):
    """Cast a matmul input to bf16 when enabled (accumulation stays f32)."""
    return x.astype(jnp.bfloat16) if USE_BF16_MATMUL else x


def _vmem_limit_bytes():
    """Generation-aware scoped-VMEM limit: ~3/4 of physical, capped at 96 MiB
    (=> ~96 MiB on v5e/v6e's 128 MiB, ~48 MiB on v7x's 64 MiB)."""
    default_cap = 128 * 1024 * 1024
    try:
        cap = int(getattr(pltpu.get_tpu_info(), "vmem_capacity_bytes",
                          default_cap))
    except Exception:
        cap = default_cap
    if cap <= 0:
        cap = default_cap
    return int(min(cap * 3 // 4, 96 * 1024 * 1024))


_VMEM_LIMIT = _vmem_limit_bytes()


def _pick_tile(dim, target, granularity=8):
    """Largest divisor of `dim` that is <= target AND a multiple of
    `granularity`; falls back to the full extent (always a legal block)."""
    best = dim
    upper = min(dim, target)
    for cand in range(upper, granularity - 1, -1):
        if dim % cand == 0 and cand % granularity == 0:
            best = cand
            break
    return best


# ----------------------------------------------------------------------------
# Kernel 1: fused linear projection + head split (+ q-scale folded in)
#   x (B, L, Din) @ w (C, Din, H*Dh) -> out (C, B, H, L, Dh)
# ----------------------------------------------------------------------------

def _project_heads_kernel(x_ref, w_ref, b_ref, o_ref, *, head_num, head_dim,
                          q_scale):
    y = jnp.dot(_mm_in(x_ref[...]), _mm_in(w_ref[...]),
                preferred_element_type=jnp.float32) + b_ref[...]
    if q_scale != 1.0:
        # 1/temperature folded into the q component (component index 0) here,
        # so the attention KV loop never rescales.
        y = y * jnp.where(pl.program_id(0) == 0, q_scale, 1.0)
    # Head split happens ONCE per projection tile (never per KV step).
    for h in range(head_num):
        o_ref[h] = y[:, h * head_dim:(h + 1) * head_dim].astype(o_ref.dtype)


def project_heads(x, w, b, head_num, q_scale=1.0, tl_target=256):
    """x: (B, L, Din), w: (C, Din, dm), b: (C, dm) -> (C, B, H, L, Dh)."""
    B, L, Din = x.shape
    C, _, dm = w.shape
    Dh = dm // head_num
    tl = _pick_tile(L, tl_target, 8)
    kernel = functools.partial(_project_heads_kernel, head_num=head_num,
                               head_dim=Dh, q_scale=q_scale)
    return pl.pallas_call(
        kernel,
        out_shape=jax.ShapeDtypeStruct((C, B, head_num, L, Dh), x.dtype),
        grid=(C, B, L // tl),
        in_specs=[
            pl.BlockSpec((None, tl, Din), lambda c, b, i: (b, i, 0)),
            pl.BlockSpec((None, Din, dm), lambda c, b, i: (c, 0, 0)),
            pl.BlockSpec((None, 1, dm), lambda c, b, i: (c, 0, 0)),
        ],
        out_specs=pl.BlockSpec((None, None, head_num, tl, Dh),
                               lambda c, b, i: (c, b, 0, i, 0)),
        compiler_params=pltpu.CompilerParams(
            dimension_semantics=("parallel", "parallel", "parallel"),
            vmem_limit_bytes=_VMEM_LIMIT),
    )(x, w, b.reshape(C, 1, dm))


# ----------------------------------------------------------------------------
# Kernel 2: flash-style multi-head attention
#   grid (B, Lq-tiles, Lk-tiles), heads batched in the dot_generals,
#   lane-dense (B, Lq, H*Dh) output written at the last KV tile.
# ----------------------------------------------------------------------------

def _mha_attention_kernel(q_ref, k_ref, v_ref, o_ref, m_sc, l_sc, acc_sc, *,
                          causal, tq, tk, head_num, head_dim):
    qi = pl.program_id(1)
    kt = pl.program_id(2)

    @pl.when(kt == 0)
    def _():
        m_sc[...] = jnp.full_like(m_sc, -1e30)
        l_sc[...] = jnp.zeros_like(l_sc)
        acc_sc[...] = jnp.zeros_like(acc_sc)

    def _compute():
        q = _mm_in(q_ref[...])          # (H, tq, Dh); 1/temperature already folded in
        k = _mm_in(k_ref[...])          # (H, tk, Dh)
        v = v_ref[...]                  # (H, tk, Dh)
        s = jax.lax.dot_general(q, k, (((2,), (2,)), ((0,), (0,))),
                                preferred_element_type=jnp.float32)  # (H, tq, tk)
        if causal:
            # In-kernel causal mask; large finite negative so fully-masked rows
            # never produce NaN.
            q_pos = jax.lax.broadcasted_iota(jnp.int32, (1, tq, tk), 1) + qi * tq
            k_pos = jax.lax.broadcasted_iota(jnp.int32, (1, tq, tk), 2) + kt * tk
            s = jnp.where(k_pos > q_pos, -1e30, s)
        m_prev = m_sc[...]
        m_new = jnp.maximum(m_prev, jnp.max(s, axis=-1, keepdims=True))
        alpha = jnp.exp(m_prev - m_new)
        p = jnp.exp(s - m_new)
        l_sc[...] = alpha * l_sc[...] + jnp.sum(p, axis=-1, keepdims=True)
        acc_sc[...] = alpha * acc_sc[...] + jax.lax.dot_general(
            _mm_in(p), _mm_in(v), (((2,), (1,)), ((0,), (0,))),
            preferred_element_type=jnp.float32)
        m_sc[...] = m_new

    if causal:
        # Skip KV tiles strictly above the diagonal (~2x less work for causal).
        @pl.when(kt * tk < (qi + 1) * tq)
        def _():
            _compute()
    else:
        _compute()

    @pl.when(kt == pl.num_programs(2) - 1)
    def _():
        normed = acc_sc[...] / l_sc[...]      # exact division (f32-faithful softmax)
        # Merge heads into the lane-dense (tq, H*Dh) output block; per-head
        # stores happen only ONCE per (b, qi), the HBM writeback is one dense
        # (tq, H*Dh) tile.
        for h in range(head_num):
            o_ref[:, h * head_dim:(h + 1) * head_dim] = (
                normed[h].astype(o_ref.dtype))


def mha_attention(q_arr, k_arr, v_arr, q_comp, k_comp, v_comp, causal,
                  tq_target=256, tk_target=256):
    """q_arr: (Cq, B, H, Lq, Dh), k_arr/v_arr: (Ck, B, H, Lk, Dh); the *_comp
    ints select the component via BlockSpec (no HBM slicing of the fused
    projection output).  Returns lane-dense (B, Lq, H*Dh)."""
    _, B, H, Lq, Dh = q_arr.shape
    Lk = k_arr.shape[3]
    Dm = H * Dh
    tq = _pick_tile(Lq, tq_target, 8)
    tk = _pick_tile(Lk, tk_target, 8)
    kernel = functools.partial(_mha_attention_kernel, causal=causal, tq=tq,
                               tk=tk, head_num=H, head_dim=Dh)
    return pl.pallas_call(
        kernel,
        out_shape=jax.ShapeDtypeStruct((B, Lq, Dm), q_arr.dtype),
        grid=(B, Lq // tq, Lk // tk),
        in_specs=[
            pl.BlockSpec((None, None, H, tq, Dh),
                         lambda b, qi, kt, c=q_comp: (c, b, 0, qi, 0)),
            pl.BlockSpec((None, None, H, tk, Dh),
                         lambda b, qi, kt, c=k_comp: (c, b, 0, kt, 0)),
            pl.BlockSpec((None, None, H, tk, Dh),
                         lambda b, qi, kt, c=v_comp: (c, b, 0, kt, 0)),
        ],
        out_specs=pl.BlockSpec((None, tq, Dm), lambda b, qi, kt: (b, qi, 0)),
        scratch_shapes=[
            pltpu.VMEM((H, tq, 1), jnp.float32),    # running max
            pltpu.VMEM((H, tq, 1), jnp.float32),    # running denominator
            pltpu.VMEM((H, tq, Dh), jnp.float32),   # running numerator
        ],
        compiler_params=pltpu.CompilerParams(
            dimension_semantics=("parallel", "parallel", "arbitrary"),
            vmem_limit_bytes=_VMEM_LIMIT),
    )(q_arr, k_arr, v_arr)


# ----------------------------------------------------------------------------
# Kernel 3: attention output projection (full-depth K = H*Dh) + residual + LN
# ----------------------------------------------------------------------------

def _out_proj_res_ln_kernel(x_ref, w_ref, b_ref, r_ref, g_ref, bb_ref, o_ref,
                            *, eps):
    z = jnp.dot(_mm_in(x_ref[...]), _mm_in(w_ref[...]),
                preferred_element_type=jnp.float32)
    z = z + b_ref[...] + r_ref[...].astype(jnp.float32)
    mu = jnp.mean(z, axis=-1, keepdims=True)
    var = jnp.mean((z - mu) ** 2, axis=-1, keepdims=True)
    zn = (z - mu) * jax.lax.rsqrt(var + eps)
    o_ref[...] = (zn * g_ref[...] + bb_ref[...]).astype(o_ref.dtype)


def out_proj_res_ln(x, w, b, res, gamma, beta, eps=1e-5, tm_target=256):
    """LayerNorm(x @ w + b + res); x: (M, Dm) lane-dense attention output."""
    M, Dm = x.shape
    D = w.shape[1]
    tm = _pick_tile(M, tm_target, 8)
    return pl.pallas_call(
        functools.partial(_out_proj_res_ln_kernel, eps=eps),
        out_shape=jax.ShapeDtypeStruct((M, D), x.dtype),
        grid=(M // tm,),
        in_specs=[
            pl.BlockSpec((tm, Dm), lambda i: (i, 0)),
            pl.BlockSpec((Dm, D), lambda i: (0, 0)),
            pl.BlockSpec((1, D), lambda i: (0, 0)),
            pl.BlockSpec((tm, D), lambda i: (i, 0)),
            pl.BlockSpec((1, D), lambda i: (0, 0)),
            pl.BlockSpec((1, D), lambda i: (0, 0)),
        ],
        out_specs=pl.BlockSpec((tm, D), lambda i: (i, 0)),
        compiler_params=pltpu.CompilerParams(
            dimension_semantics=("parallel",),
            vmem_limit_bytes=_VMEM_LIMIT),
    )(x, w, b.reshape(1, D), res, gamma.reshape(1, D), beta.reshape(1, D))


# ----------------------------------------------------------------------------
# Kernel 4: fused feedforward (Linear->ReLU->Linear->ReLU) + residual + LN,
#           with the filter dimension as a tiled reduction axis.
# ----------------------------------------------------------------------------

def _ffn_res_ln_kernel(x_ref, w1_ref, b1_ref, w2_ref, b2_ref, r_ref, g_ref,
                       bb_ref, o_ref, acc_ref, *, eps):
    f = pl.program_id(1)

    @pl.when(f == 0)
    def _():
        acc_ref[...] = jnp.zeros_like(acc_ref)

    h = jnp.dot(_mm_in(x_ref[...]), _mm_in(w1_ref[...]),
                preferred_element_type=jnp.float32) + b1_ref[...]
    h = jnp.maximum(h, 0.0)                                   # ReLU after linear1
    acc_ref[...] += jnp.dot(_mm_in(h), _mm_in(w2_ref[...]),
                            preferred_element_type=jnp.float32)

    @pl.when(f == pl.num_programs(1) - 1)
    def _():
        # ReLU after linear2 as well, matching the reference Feedforward.
        y = jnp.maximum(acc_ref[...] + b2_ref[...], 0.0)
        z = y + r_ref[...].astype(jnp.float32)
        mu = jnp.mean(z, axis=-1, keepdims=True)
        var = jnp.mean((z - mu) ** 2, axis=-1, keepdims=True)
        zn = (z - mu) * jax.lax.rsqrt(var + eps)
        o_ref[...] = (zn * g_ref[...] + bb_ref[...]).astype(o_ref.dtype)


def ffn_res_ln(x, w1, b1, w2, b2, res, gamma, beta, eps=1e-5,
               tm_target=256, tf_target=512):
    """LayerNorm(relu(relu(x@w1+b1)@w2+b2) + res); the (tm, F) intermediate
    stays in VMEM and the filter dim F is streamed in tiles."""
    M, D = x.shape
    F = w1.shape[1]
    tm = _pick_tile(M, tm_target, 8)
    tf = _pick_tile(F, tf_target, 128)
    return pl.pallas_call(
        functools.partial(_ffn_res_ln_kernel, eps=eps),
        out_shape=jax.ShapeDtypeStruct((M, D), x.dtype),
        grid=(M // tm, F // tf),
        in_specs=[
            pl.BlockSpec((tm, D), lambda i, f: (i, 0)),
            pl.BlockSpec((D, tf), lambda i, f: (0, f)),
            pl.BlockSpec((1, tf), lambda i, f: (0, f)),
            pl.BlockSpec((tf, D), lambda i, f: (f, 0)),
            pl.BlockSpec((1, D), lambda i, f: (0, 0)),
            pl.BlockSpec((tm, D), lambda i, f: (i, 0)),
            pl.BlockSpec((1, D), lambda i, f: (0, 0)),
            pl.BlockSpec((1, D), lambda i, f: (0, 0)),
        ],
        out_specs=pl.BlockSpec((tm, D), lambda i, f: (i, 0)),
        scratch_shapes=[pltpu.VMEM((tm, D), jnp.float32)],
        compiler_params=pltpu.CompilerParams(
            dimension_semantics=("parallel", "arbitrary"),
            vmem_limit_bytes=_VMEM_LIMIT),
    )(x, w1, b1.reshape(1, F), w2, b2.reshape(1, D), res,
      gamma.reshape(1, D), beta.reshape(1, D))


# ----------------------------------------------------------------------------
# Decoder layer (glue in plain JAX: only free reshapes, no HBM slices/copies)
# ----------------------------------------------------------------------------

def transformer_decoder_layer(tgt, src, params, head_num):
    """tgt_prev == None branch of TransformerDecoderLayer.forward; the
    self-attention uses the standard causal tgt_mask, generated in-kernel."""
    # TODO(synk): arbitrary user-supplied tgt_mask tensors and the tgt_prev
    # (incremental decoding) branch are not plumbed into the flash kernel.
    B, Lt, D = tgt.shape
    p = params
    sa, ca, ff = p["self_attn"], p["cross_attn"], p["ff"]
    dm = sa["w_qkv"].shape[-1]
    # Reference temperature = sqrt(head_num * head_dim) = sqrt(dm); folded
    # into q inside the projection kernel.
    q_scale = 1.0 / float(dm) ** 0.5

    # ---- self-attention + residual + LayerNorm ----
    qkv = project_heads(tgt, sa["w_qkv"], sa["b_qkv"], head_num,
                        q_scale=q_scale)                       # (3,B,H,Lt,Dh)
    att = mha_attention(qkv, qkv, qkv, 0, 1, 2, causal=True)   # (B,Lt,dm)
    out = out_proj_res_ln(att.reshape(B * Lt, dm), sa["wo"], sa["bo"],
                          tgt.reshape(B * Lt, D), p["ln1_g"], p["ln1_b"])
    out = out.reshape(B, Lt, D)

    # ---- cross-attention + residual + LayerNorm ----
    qx = project_heads(out, ca["wq"], ca["bq"], head_num,
                       q_scale=q_scale)                        # (1,B,H,Lt,Dh)
    kv = project_heads(src, ca["w_kv"], ca["b_kv"], head_num)  # (2,B,H,Ls,Dh)
    att = mha_attention(qx, kv, kv, 0, 0, 1, causal=False)     # (B,Lt,dm)
    out2 = out_proj_res_ln(att.reshape(B * Lt, dm), ca["wo"], ca["bo"],
                           out.reshape(B * Lt, D), p["ln2_g"], p["ln2_b"])

    # ---- feedforward + residual + LayerNorm ----
    out3 = ffn_res_ln(out2, ff["w1"], ff["b1"], ff["w2"], ff["b2"], out2,
                      p["ln3_g"], p["ln3_b"])
    return out3.reshape(B, Lt, D)


# ----------------------------------------------------------------------------
# Deterministic parameter construction.  Fused per-component weights are the
# column-concatenation of the reference's separate nn.Linear weights
# (mathematically equivalent parameterization).
# ----------------------------------------------------------------------------

def init_params(key, input_size, src_size, filter_size, head_num):
    dm = (input_size // head_num) * head_num     # head_num * head_dim
    keys = iter(jax.random.split(key, 24))

    def w(shape):
        return jax.random.normal(next(keys), shape, jnp.float32) * 0.05

    self_attn = dict(
        w_qkv=w((3, input_size, dm)), b_qkv=w((3, dm)),
        wo=w((dm, input_size)), bo=w((input_size,)),
    )
    cross_attn = dict(
        wq=w((1, input_size, dm)), bq=w((1, dm)),
        w_kv=w((2, src_size, dm)), b_kv=w((2, dm)),
        wo=w((dm, input_size)), bo=w((input_size,)),
    )
    ffp = dict(
        w1=w((input_size, filter_size)), b1=w((filter_size,)),
        w2=w((filter_size, input_size)), b2=w((input_size,)),
    )
    return dict(
        self_attn=self_attn, cross_attn=cross_attn, ff=ffp,
        ln1_g=jnp.ones((input_size,), jnp.float32),
        ln1_b=jnp.zeros((input_size,), jnp.float32),
        ln2_g=jnp.ones((input_size,), jnp.float32),
        ln2_b=jnp.zeros((input_size,), jnp.float32),
        ln3_g=jnp.ones((input_size,), jnp.float32),
        ln3_b=jnp.zeros((input_size,), jnp.float32),
    )


# ----------------------------------------------------------------------------
# Main
# ----------------------------------------------------------------------------

if __name__ == "__main__":
    B, Lt, Ls = 2, 8, 16
    input_size, src_size, filter_size, head_num = 32, 48, 64, 4

    key = jax.random.PRNGKey(0)
    k_tgt, k_src, k_par = jax.random.split(key, 3)

    tgt = jax.random.normal(k_tgt, (B, Lt, input_size), jnp.float32)
    src = jax.random.normal(k_src, (B, Ls, src_size), jnp.float32)

    params = init_params(k_par, input_size, src_size, filter_size, head_num)

    out = transformer_decoder_layer(tgt, src, params, head_num)
    out = jax.block_until_ready(out)
    assert out.shape == (B, Lt, input_size), out.shape
    print("KERNEL_OK")
</pallas_src>

<mosaic_0001>
module attributes {stable_mosaic.version = 11 : i64} {
  func.func @_project_heads_kernel(%arg0: i32, %arg1: i32, %arg2: i32, %arg3: memref<1x8x32xf32, #tpu.memory_space<vmem>>, %arg4: memref<1x32x32xf32, #tpu.memory_space<vmem>>, %arg5: memref<1x1x32xf32, #tpu.memory_space<vmem>>, %arg6: memref<1x1x4x8x8xf32, #tpu.memory_space<vmem>>) attributes {dimension_semantics = [#tpu.dimension_semantics<parallel>, #tpu.dimension_semantics<parallel>, #tpu.dimension_semantics<parallel>], iteration_bounds = array<i64: 3, 2, 1>, scalar_prefetch = 0 : i64, scratch_operands = 0 : i64, tpu.core_type = #tpu.core_type<tc>, window_params = [{transform_indices = @transform_0, window_bounds = array<i64: 1, 8, 32>}, {transform_indices = @transform_1, window_bounds = array<i64: 1, 32, 32>}, {transform_indices = @transform_2, window_bounds = array<i64: 1, 1, 32>}, {transform_indices = @transform_3, window_bounds = array<i64: 1, 1, 4, 8, 8>}]} {
    %c0 = arith.constant 0 : index
    %c0_0 = arith.constant 0 : index
    %c0_1 = arith.constant 0 : index
    %0 = vector.load %arg3[%c0, %c0_0, %c0_1] : memref<1x8x32xf32, #tpu.memory_space<vmem>>, vector<1x8x32xf32>
    %1 = vector.shape_cast %0 : vector<1x8x32xf32> to vector<8x32xf32>
    %c0_2 = arith.constant 0 : index
    %c0_3 = arith.constant 0 : index
    %c0_4 = arith.constant 0 : index
    %2 = vector.load %arg4[%c0_2, %c0_3, %c0_4] : memref<1x32x32xf32, #tpu.memory_space<vmem>>, vector<1x32x32xf32>
    %3 = vector.shape_cast %2 : vector<1x32x32xf32> to vector<32x32xf32>
    %cst = arith.constant dense<0.000000e+00> : vector<8x32xf32>
    %4 = tpu.matmul %1, %3, %cst {dimension_numbers = #tpu.dot_dimension_numbers<[1], [0], [0], [1], [0, 0, 1, 1], [], []>} : vector<8x32xf32>, vector<32x32xf32>, vector<8x32xf32> -> vector<8x32xf32>
    %c0_5 = arith.constant 0 : index
    %c0_6 = arith.constant 0 : index
    %c0_7 = arith.constant 0 : index
    %5 = vector.load %arg5[%c0_5, %c0_6, %c0_7] : memref<1x1x32xf32, #tpu.memory_space<vmem>>, vector<1x1x32xf32>
    %6 = vector.shape_cast %5 : vector<1x1x32xf32> to vector<1x32xf32>
    %7 = vector.broadcast %6 : vector<1x32xf32> to vector<8x32xf32>
    %8 = arith.addf %4, %7 : vector<8x32xf32>
    %c0_i32 = arith.constant 0 : i32
    %9 = arith.cmpi eq, %arg0, %c0_i32 : i32
    %cst_8 = arith.constant 0.176776692 : f32
    %cst_9 = arith.constant 1.000000e+00 : f32
    %10 = arith.select %9, %cst_8, %cst_9 : f32
    %11 = vector.broadcast %10 : f32 to vector<8x32xf32>
    %12 = arith.mulf %8, %11 : vector<8x32xf32>
    %13 = vector.extract_strided_slice %12 {offsets = [0, 0], sizes = [8, 8], strides = [1, 1]} : vector<8x32xf32> to vector<8x8xf32>
    %c0_10 = arith.constant 0 : index
    %c0_11 = arith.constant 0 : index
    %c0_12 = arith.constant 0 : index
    %c0_13 = arith.constant 0 : index
    %c0_14 = arith.constant 0 : index
    %14 = vector.load %arg6[%c0_10, %c0_11, %c0_12, %c0_13, %c0_14] : memref<1x1x4x8x8xf32, #tpu.memory_space<vmem>>, vector<1x1x1x8x8xf32>
    %15 = vector.shape_cast %14 : vector<1x1x1x8x8xf32> to vector<8x8xf32>
    %16 = vector.shape_cast %13 : vector<8x8xf32> to vector<1x1x1x8x8xf32>
    tpu.vector_store %arg6[%c0_10, %c0_11, %c0_12, %c0_13, %c0_14], %16 {strides = array<i32>} : memref<1x1x4x8x8xf32, #tpu.memory_space<vmem>>, vector<1x1x1x8x8xf32>,
    %17 = vector.extract_strided_slice %12 {offsets = [0, 8], sizes = [8, 8], strides = [1, 1]} : vector<8x32xf32> to vector<8x8xf32>
    %c0_15 = arith.constant 0 : index
    %c0_16 = arith.constant 0 : index
    %c1 = arith.constant 1 : index
    %c0_17 = arith.constant 0 : index
    %c0_18 = arith.constant 0 : index
    %18 = vector.load %arg6[%c0_15, %c0_16, %c1, %c0_17, %c0_18] : memref<1x1x4x8x8xf32, #tpu.memory_space<vmem>>, vector<1x1x1x8x8xf32>
    %19 = vector.shape_cast %18 : vector<1x1x1x8x8xf32> to vector<8x8xf32>
    %20 = vector.shape_cast %17 : vector<8x8xf32> to vector<1x1x1x8x8xf32>
    tpu.vector_store %arg6[%c0_15, %c0_16, %c1, %c0_17, %c0_18], %20 {strides = array<i32>} : memref<1x1x4x8x8xf32, #tpu.memory_space<vmem>>, vector<1x1x1x8x8xf32>,
    %21 = vector.extract_strided_slice %12 {offsets = [0, 16], sizes = [8, 8], strides = [1, 1]} : vector<8x32xf32> to vector<8x8xf32>
    %c0_19 = arith.constant 0 : index
    %c0_20 = arith.constant 0 : index
    %c2 = arith.constant 2 : index
    %c0_21 = arith.constant 0 : index
    %c0_22 = arith.constant 0 : index
    %22 = vector.load %arg6[%c0_19, %c0_20, %c2, %c0_21, %c0_22] : memref<1x1x4x8x8xf32, #tpu.memory_space<vmem>>, vector<1x1x1x8x8xf32>
    %23 = vector.shape_cast %22 : vector<1x1x1x8x8xf32> to vector<8x8xf32>
    %24 = vector.shape_cast %21 : vector<8x8xf32> to vector<1x1x1x8x8xf32>
    tpu.vector_store %arg6[%c0_19, %c0_20, %c2, %c0_21, %c0_22], %24 {strides = array<i32>} : memref<1x1x4x8x8xf32, #tpu.memory_space<vmem>>, vector<1x1x1x8x8xf32>,
    %25 = vector.extract_strided_slice %12 {offsets = [0, 24], sizes = [8, 8], strides = [1, 1]} : vector<8x32xf32> to vector<8x8xf32>
    %c0_23 = arith.constant 0 : index
    %c0_24 = arith.constant 0 : index
    %c3 = arith.constant 3 : index
    %c0_25 = arith.constant 0 : index
    %c0_26 = arith.constant 0 : index
    %26 = vector.load %arg6[%c0_23, %c0_24, %c3, %c0_25, %c0_26] : memref<1x1x4x8x8xf32, #tpu.memory_space<vmem>>, vector<1x1x1x8x8xf32>
    %27 = vector.shape_cast %26 : vector<1x1x1x8x8xf32> to vector<8x8xf32>
    %28 = vector.shape_cast %25 : vector<8x8xf32> to vector<1x1x1x8x8xf32>
    tpu.vector_store %arg6[%c0_23, %c0_24, %c3, %c0_25, %c0_26], %28 {strides = array<i32>} : memref<1x1x4x8x8xf32, #tpu.memory_space<vmem>>, vector<1x1x1x8x8xf32>,
    return
  }
  func.func @transform_0(%arg0: i32, %arg1: i32, %arg2: i32) -> (i32, i32, i32) {
    %c0_i32 = arith.constant 0 : i32
    %c0_i32_0 = arith.constant 0 : i32
    return %arg1, %arg2, %c0_i32 : i32, i32, i32
  }
  func.func @transform_1(%arg0: i32, %arg1: i32, %arg2: i32) -> (i32, i32, i32) {
    %c0_i32 = arith.constant 0 : i32
    %c0_i32_0 = arith.constant 0 : i32
    %c0_i32_1 = arith.constant 0 : i32
    return %arg0, %c0_i32, %c0_i32_0 : i32, i32, i32
  }
  func.func @transform_2(%arg0: i32, %arg1: i32, %arg2: i32) -> (i32, i32, i32) {
    %c0_i32 = arith.constant 0 : i32
    %c0_i32_0 = arith.constant 0 : i32
    %c0_i32_1 = arith.constant 0 : i32
    return %arg0, %c0_i32, %c0_i32_0 : i32, i32, i32
  }
  func.func @transform_3(%arg0: i32, %arg1: i32, %arg2: i32) -> (i32, i32, i32, i32, i32) {
    %c0_i32 = arith.constant 0 : i32
    %c0_i32_0 = arith.constant 0 : i32
    %c0_i32_1 = arith.constant 0 : i32
    return %arg0, %arg1, %c0_i32, %arg2, %c0_i32_0 : i32, i32, i32, i32, i32
  }
}

</mosaic_0001>

<bundles_post_ra>
// kernel: tpu_custom_call.1
= control target key start
LH: loop header
LB: loop body
LE: loop exit
PB: predicated region body
PF: predicated region fallthrough
CT: control target
= control target key end

     0   :  { %s1377_s0 = inlined_call_operand.hbm [shape: f32[2,8,32], index: 0, kind: input, shape index: {}]   ;;  %s1378_s1 = inlined_call_operand.hbm [shape: f32[3,32,32], index: 1, kind: input, shape index: {}]   ;;  %s1379_s2 = inlined_call_operand.hbm [shape: f32[3,1,32], index: 2, kind: input, shape index: {}]   ;;  %s1380_s3 = inlined_call_operand.hbm [shape: f32[3,2,4,8,8], index: 3, kind: output, shape index: {}]  }
   0x1   :  { %1394 = sst [smem:[#allocation21_spill]] %s1377_s0 }
   0x2   :  { %1395 = sst [smem:[#allocation22_spill]] %s1378_s1 }
   0x3   :  { %1396 = sst [smem:[#allocation23_spill]] %s1380_s3 }
   0x4   :  { %8 = vsyncpa [#allocation3], 0 }
   0x5   :  { %10 = vsyncpa [#allocation3 + $0x1], 0 }
   0x6   :  { %11 = vsyncpa [#allocation6], 0 }
   0x7   :  { %13 = vsyncpa [#allocation6 + $0x1], 0 }
   0x8   :  { %14 = vsyncpa [#allocation4], 0 }
   0x9   :  { %16 = vsyncpa [#allocation4 + $0x1], 0  ;;  %s1010_s12 = smov 0   ;;  %s1012_s13 = smov 0  }
   0xa   :  { %s1014_s14 = smov 0   ;;  %s1016_s15 = smov 0  }
   0xb   :  { %s1018_s16 = smov 0   ;;  %s1020_s17 = smov 0  }
   0xc   :  { %s1022_s18 = smov 0   ;;  %s1024_s19 = smov 0  }
   0xd   :  { %s1026_s20 = smov 0   ;;  %s1028_s21 = smov 0  }
   0xe   :  { %s1030_s22 = smov 0   ;;  %s1032_s23 = smov 0  }
   0xf   :  { %s1034_s24 = smov 0   ;;  %s1036_s25 = smov 0  }
  0x10 LB: > { %1397 = sst [smem:[#allocation12_spill]] %s954_s20  ;;  %p1382_p0 = scmp.eq.s32.totalorder %s974_s25, 0  ;;  %s974_s25 = sphi %s1036_s25, %s22_s25   ;;  %s970_s24 = sphi %s1034_s24, %s1448_s24   ;;  %s966_s23 = sphi %s1032_s23, %s1437_s23   ;;  %s962_s22 = sphi %s1030_s22, %s1447_s22   ;;  %s958_s21 = sphi %s1028_s21, %s1436_s21   ;;  %s954_s20 = sphi %s1026_s20, %s1435_s20   ;;  %s950_s19 = sphi %s1024_s19, %s1446_s19   ;;  %s946_s18 = sphi %s1022_s18, %s1445_s18   ;;  %s942_s17 = sphi %s1020_s17, %s1444_s17   ;;  %s938_s16 = sphi %s1018_s16, %s1443_s16   ;;  %s934_s15 = sphi %s1016_s15, %s1442_s15   ;;  %s930_s14 = sphi %s1014_s14, %s1441_s14   ;;  %s926_s13 = sphi %s1012_s13, %s1440_s13   ;;  %s922_s12 = sphi %s1010_s12, %s1439_s12  }
  0x11   : > { %1398 = sst [smem:[#allocation13_spill]] %s958_s21  ;;  %p83_p1 = scmp.ne.s32.totalorder %s942_s17, %s938_s16 }
  0x12   : > { %1399 = sst [smem:[#allocation14_spill]] %s962_s22  ;;  %p1381_p4 = scmp.lt.s32.totalorder %s974_s25, 6 }
  0x13   : > { %1400 = sst [smem:[#allocation15_spill]] %s966_s23  ;;  %p85_p3 = por %p83_p1, %p1382_p0 }
  0x14   : > { %s188_s26 = sand.u32 1, %s974_s25   ;;  %s1383_s27 = sand.u32 1, %s942_s17  }
  0x15   : > { %s546_s28 = sshll.u32 %s1383_s27, 5  ;;  %s565_s29 = sshll.u32 %s970_s24, 9 }
  0x16   : > { %s1401_s1 = sld [smem:[#allocation22_spill]]  ;;  %s192_s6 = scalar_lea.vmem [#allocation5], %s546_s28 }
  0x17   : > { %s199_s7 = sshll.u32 %s192_s6, 4  ;;  %p1102_p5 = pnand %p1381_p4, %p85_p3  ;;  %s1098_s7 = int_to_ptr.vmem [resolvable:$true] %s199_s7 }
  0x18   : > { %p550_p6 = scmp.ge.s32.totalorder %s974_s25, 1  ;;  %s1107_s9 = scalar_lea.sflag [#allocation6], %s188_s26 }
  0x19   : > { %p1390_p8 = pneg %p1102_p5 }
  0x1c   : > { %s1096_s5 = scalar_lea.hbm %s1401_s1, %s565_s29  ;;  %s739_s29 = scalar_lea.hbm %s1401_s1, 1536 }
  0x1d   : > { %s734_s10 = scalar_lea.hbm %s1096_s5, 512  ;;  %p740_p11 = scmp.lt.u32.totalorder %s1096_s5, %s1401_s1 }
  0x1e   : > { %p735_p7 = scmp.ne.s32.totalorder %s1096_s5, %s734_s10  ;;  %p741_p12 = scmp.lt.u32.totalorder %s739_s29, %s734_s10 }
  0x1f   : > { %p743_p1 = scmp.lt.u32.totalorder %s734_s10, %s1096_s5 }
  0x20   : > { %p737_p9 = pnand %p1390_p8, %p735_p7  ;;  %p742_p13 = por %p741_p12, %p740_p11 }
  0x22   : > { %p738_p10 = pneg %p737_p9  ;;  %p744_p3 = por %p743_p1, %p742_p13 }
  0x24   : > { %p745_p4 = pnand %p744_p3, %p738_p10 }
  0x26   : > { %748 = shalt.err (!%p745_p4)
}
  0x27   : > { %s749_s26 = scalar_lea.vmem %s1098_s7, 512  ;;  %s976_s6 = smov [#allocation5]  }
  0x28   : > { %p750_p7 = scmp.ne.s32.totalorder %s1098_s7, %s749_s26  ;;  %s754_s11 = sshll.u32 %s976_s6, 4  ;;  %s755_s11 = int_to_ptr.vmem [resolvable:$false] %s754_s11 }
  0x29   : > { %s756_s28 = scalar_lea.vmem %s755_s11, 1024  ;;  %p757_p0 = scmp.lt.s32.totalorder %s1098_s7, %s755_s11 }
  0x2a   : > { %p752_p9 = pnand %p750_p7, %p1390_p8  ;;  %p758_p11 = scmp.lt.s32.totalorder %s756_s28, %s749_s26 }
  0x2c   : > { %p753_p2 = pneg %p752_p9  ;;  %p759_p12 = por %p758_p11, %p757_p0 }
  0x2e   : > { %p760_p13 = pnand %p759_p12, %p753_p2 }
  0x30   : > { %763 = shalt.err (!%p760_p13)
}
  0x31   : > { %s977_s10 = smov 128   ;;  %s978_s29 = smov 8  }
  0x32   : > { %602 = dma.hbm_to_vmem [thread:$0]  (!%p1102_p5), %s1096_s5, 512, %s1098_s7, %s1107_s9, %s977_s10, %s977_s10, %s978_s29  }
  0x33   : > { %p224_p0 = scmp.lt.s32.totalorder %s974_s25, 7  ;;  %s1143_s4 = sadd.s32 4294967295, %s974_s25  }
  0x34   : > { %s37_s6 = sadd.s32 1, %s966_s23  ;;  %s41_s11 = sadd.s32 1, %s970_s24 }
  0x35   : > { %p1138_p2 = pnand %p550_p6, %p224_p0  ;;  %p39_p4 = scmp.ge.s32.totalorder %s37_s6, 2 }
  0x36   : > { %s50_s28 = sadd.s32 1, %s954_s20  ;;  %p57_p10 = scmp.ne.s32.totalorder %s954_s20, %s950_s19 }
  0x37   : > { %s1403_s30 = scalar_select %p1138_p2, 1, 0 }
  0x38   : > { %p63_p1 = scmp.ne.s32.totalorder %s950_s19, %s946_s18  ;;  %s1450_s6 = smov (%p39_p4, %s37_s6), 0 }
  0x39   : > { %1404 = sst [smem:[#allocation16_spill]] %s1450_s6  ;;  %s1452_s11 = smov (!%p39_p4, %s41_s11), %s970_s24 }
  0x3a   : > { %s45_s5 = ssub.s32 %s966_s23, %s1450_s6  ;;  %p1405_p6 = scmp.eq.s32.totalorder %s974_s25, 0 }
  0x3b   : > { %p43_p7 = scmp.ge.s32.totalorder %s1452_s11, 3  ;;  %p48_p9 = scmp.eq.s32.totalorder %s45_s5, 0 }
  0x3c   : > { %p1160_p3 = por %p1405_p6, %p57_p10  ;;  %p64_p11 = scmp.eq.s32.totalorder %s1143_s4, 0 }
  0x3d   : > { %s76_s18 = sadd.s32 1, %s942_s17  ;;  %s1454_s11 = smov (%p43_p7, %s1452_s11), 0 }
  0x3e   : > { %1407 = sst [smem:[#allocation17_spill]] %s1454_s11  ;;  %p1171_p12 = por %p64_p11, %p63_p1 }
  0x3f   : > { %s1169_s10 = scalar_select %p48_p9, %s954_s20, %s50_s28  }
  0x40   : > { %s1409_s29 = scalar_select %p1171_p12, 1, 0 }
  0x41   : > { %1408 = sst [smem:[#allocation18_spill]] %s1169_s10  ;;  %s73_s27 = ssub.s32 %s970_s24, %s1454_s11 }
  0x42   : > { %p74_p13 = scmp.eq.s32.totalorder %s73_s27, 0  ;;  %p1410_p0 = scmp.ne.s32.totalorder %s938_s16, %s934_s15 }
  0x43   : > { %s127_s1 = sor.u32 %s73_s27, %s45_s5  ;;  %s132_s6 = sadd.s32 1, %s930_s14 }
  0x44   : > { %p1180_p4 = por %p1410_p0, %p64_p11  ;;  %p130_p10 = scmp.eq.s32.totalorder %s127_s1, 0 }
  0x45   : > { %s1186_s3 = scalar_select %p74_p13, %s942_s17, %s76_s18  }
  0x46   : > { %s1411_s26 = scalar_select %p1180_p4, 1, 0 }
  0x47   : > { %1412 = sst [smem:[#allocation19_spill]] %s1186_s3  ;;  %p142_p6 = scmp.ne.s32.totalorder %s930_s14, %s926_s13 }
  0x48   : > { %p143_p7 = scmp.eq.s32.totalorder %s1143_s4, 5  ;;  %p148_p1 = scmp.ne.s32.totalorder %s926_s13, %s922_s12 }
  0x49   : > { %s1194_s28 = scalar_select %p130_p10, %s930_s14, %s132_s6  }
  0x4a   : > { %p1196_p9 = por %p143_p7, %p142_p6  ;;  %s1415_s15 = sadd.s32 4294967294, %s974_s25  }
  0x4b   : > { %1413 = sst [smem:[#allocation20_spill]] %s1194_s28  ;;  %p149_p11 = scmp.eq.s32.totalorder %s1415_s15, 5 }
  0x4c   : > { %s1414_s11 = scalar_select %p1196_p9, 1, 0 }
  0x4d   : > { %s169_s10 = sand.u32 1, %s954_s20   ;;  %s545_s21 = sshll.u32 %s966_s23, 7 }
  0x4e   : > { %p1204_p0 = por %p149_p11, %p148_p1  ;;  %s544_s27 = sshll.u32 %s169_s10, 3 }
  0x4f   : > { %s1417_s0 = sld [smem:[#allocation21_spill]]  ;;  %p1418_p13 = scmp.lt.s32.totalorder %s974_s25, 6 }
  0x50   : > { %s1416_s22 = scalar_select %p1204_p0, 1, 0 }
  0x51   : > { %p1217_p10 = pnand %p1418_p13, %p1160_p3  ;;  %s173_s15 = scalar_lea.vmem [#allocation2], %s544_s27 }
  0x52   : > { %s181_s23 = sshll.u32 %s173_s15, 4  ;;  %s170_s20 = scalar_lea.sflag [#allocation3], %s169_s10  ;;  %s1221_s23 = int_to_ptr.vmem [resolvable:$true] %s181_s23 }
  0x53   : > { %p766_p7 = pneg %p1217_p10 }
  0x55   : > { %s1211_s18 = scalar_lea.hbm %s1417_s0, %s545_s21  ;;  %s769_s1 = scalar_lea.hbm %s1417_s0, 256 }
  0x56   : > { %s764_s5 = scalar_lea.hbm %s1211_s18, 128  ;;  %p770_p3 = scmp.lt.u32.totalorder %s1211_s18, %s1417_s0 }
  0x57   : > { %p765_p6 = scmp.ne.s32.totalorder %s1211_s18, %s764_s5  ;;  %p771_p13 = scmp.lt.u32.totalorder %s769_s1, %s764_s5 }
  0x58   : > { %p773_p0 = scmp.lt.u32.totalorder %s764_s5, %s1211_s18 }
  0x59   : > { %p767_p1 = pnand %p766_p7, %p765_p6  ;;  %p772_p8 = por %p771_p13, %p770_p3 }
  0x5b   : > { %p768_p11 = pneg %p767_p1  ;;  %p774_p9 = por %p773_p0, %p772_p8 }
  0x5d   : > { %p775_p4 = pnand %p774_p9, %p768_p11 }
  0x5f   : > { %778 = shalt.err (!%p775_p4)
}
  0x60   : > { %s779_s10 = scalar_lea.vmem %s1221_s23, 128  ;;  %s979_s27 = smov [#allocation2]  }
  0x61   : > { %p780_p6 = scmp.ne.s32.totalorder %s1221_s23, %s779_s10  ;;  %s784_s15 = sshll.u32 %s979_s27, 4  ;;  %s785_s15 = int_to_ptr.vmem [resolvable:$false] %s784_s15 }
  0x62   : > { %s786_s3 = scalar_lea.vmem %s785_s15, 256  ;;  %p787_p2 = scmp.lt.s32.totalorder %s1221_s23, %s785_s15 }
  0x63   : > { %p782_p1 = pnand %p780_p6, %p766_p7  ;;  %p788_p3 = scmp.lt.s32.totalorder %s786_s3, %s779_s10 }
  0x65   : > { %p783_p12 = pneg %p782_p1  ;;  %p789_p13 = por %p788_p3, %p787_p2 }
  0x67   : > { %p790_p8 = pnand %p789_p13, %p783_p12 }
  0x69   : > { %793 = shalt.err (!%p790_p8)
}
  0x6a   : > { %599 = dma.hbm_to_vmem [thread:$0]  (!%p1217_p10), %s1211_s18, 128, %s1221_s23, %s170_s20  }
  0x6b   : > { %s549_s28 = sshll.u32 %s970_s24, 4  ;;  %s1420_s5 = sand.u32 1, %s942_s17  }
  0x6c   : > { %s212_s21 = scalar_lea.vmem [#allocation7], %s1420_s5  ;;  %s217_s15 = scalar_lea.hbm %s1379_s2, %s549_s28 }
  0x6d   : > { %s219_s7 = sshll.u32 %s212_s21, 4  ;;  %s794_s10 = scalar_lea.hbm %s217_s15, 16  ;;  %s220_s7 = int_to_ptr.vmem [resolvable:$true] %s219_s7 }
  0x6e   : > { %p795_p2 = scmp.ne.s32.totalorder %s217_s15, %s794_s10  ;;  %p1421_p12 = pneg %p1102_p5 }
  0x6f   : > { %s799_s0 = scalar_lea.hbm %s1379_s2, 48  ;;  %p800_p0 = scmp.lt.u32.totalorder %s217_s15, %s1379_s2 }
  0x70   : > { %p797_p4 = pnand %p795_p2, %p1421_p12  ;;  %p801_p10 = scmp.lt.u32.totalorder %s799_s0, %s794_s10 }
  0x71   : > { %p803_p11 = scmp.lt.u32.totalorder %s794_s10, %s217_s15 }
  0x72   : > { %p798_p9 = pneg %p797_p4  ;;  %p802_p7 = por %p801_p10, %p800_p0 }
  0x74   : > { %p804_p6 = por %p803_p11, %p802_p7 }
  0x76   : > { %p805_p1 = pnand %p804_p6, %p798_p9 }
  0x78   : > { %808 = shalt.err (!%p805_p1)
}
  0x79   : > { %s809_s18 = scalar_lea.vmem %s220_s7, 16  ;;  %p1422_p13 = pmov %p1421_p12 }
  0x7a   : > { %p810_p3 = scmp.ne.s32.totalorder %s220_s7, %s809_s18  ;;  %s980_s28 = smov [#allocation7]  }
  0x7b   : > { %s814_s5 = sshll.u32 %s980_s28, 4  ;;  %s815_s5 = int_to_ptr.vmem [resolvable:$false] %s814_s5 }
  0x7c   : > { %p812_p8 = pnand %p810_p3, %p1422_p13  ;;  %s816_s21 = scalar_lea.vmem %s815_s5, 32 }
  0x7d   : > { %p817_p12 = scmp.lt.s32.totalorder %s220_s7, %s815_s5  ;;  %p818_p4 = scmp.lt.s32.totalorder %s816_s21, %s809_s18 }
  0x7e   : > { %p813_p2 = pneg %p812_p8 }
  0x7f   : > { %p819_p0 = por %p818_p4, %p817_p12 }
  0x81   : > { %p820_p10 = pnand %p819_p0, %p813_p2 }
  0x83   : > { %823 = shalt.err (!%p820_p10)
}
  0x84   : > { %605 = dma.hbm_to_vmem [thread:$0]  (!%p1102_p5), %s217_s15, 16, %s220_s7, %s1107_s9  }
  0x85   : > { %p1423_p9 = scmp.ne.s32.totalorder %s1403_s30, 0 }
  0x86   : > { %s230_s0 = sand.u32 (!%p1423_p9), 1, %s950_s19   ;;  %p1424_p7 = scmp.ne.s32.totalorder (!%p1423_p9), %s1409_s29, 0 }
  0x87   : > { %228 = sbr.rel (%p1423_p9) target bundleno = 509 (0x1fd), region = 32  ;;  %s551_s1 = sshll.u32 (!%p1423_p9), %s230_s0, 3 }
  0x88   : > { %s231_s27 = scalar_lea.sflag (!%p1423_p9), [#allocation3], %s230_s0  ;;  %s234_s10 = scalar_lea.vmem (!%p1423_p9), [#allocation2], %s551_s1 }
  0x8e   : > { %909 = dma.done.wait (%p1424_p7), %s231_s27, 128  }
  0x8f   : > { %911 = vsyncadd (%p1424_p7), %s231_s27, 4294967168  ;;  %s239_s8 = sand.u32 1, %s1143_s4   ;;  %s241_s6 = sand.u32 1, %s938_s16  }
  0x90   : > { %s552_s9 = sshll.u32 %s241_s6, 5  ;;  %s240_s7 = scalar_lea.sflag [#allocation6], %s239_s8 }
  0x91   : > { %s243_s30 = scalar_lea.vmem [#allocation5], %s552_s9  ;;  %p1425_p5 = scmp.ne.s32.totalorder %s1411_s26, 0 }
  0x93   : > { %913 = dma.done.wait (%p1425_p5), %s240_s7, 528  }
  0x94   : > { %915 = vsyncadd (%p1425_p5), %s240_s7, 4294966768  ;;  %v981_v0 = vmov 0.0|0.0   ;;  %s1426_s15 = sld [smem:[#allocation14_spill]]  ;;  %vm982_vm0 = vmmov 0   ;;  %v983_v1 = vmov 0.0   ;;  %v284_v2 = vld [vmem:[%s243_s30] sm:$0xff] }
  0x95   : > { %582 = vmatprep.subr.bf16.mxu0 %v981_v0  ;;  %579 = vmatprep.mubr.msk.f32.mxu0 %vm982_vm0, %v983_v1  ;;  %v285_v3 = vld [vmem:[%s243_s30 + $0x8] sm:$0xff]  ;;  %v286_v4 = vld [vmem:[%s243_s30 + $0x10] sm:$0xff]  ;;  %v287_v6 = vld [vmem:[%s243_s30 + $0x18] sm:$0xff]  ;;  %vm295_vm1 = vcmask 261120   ;;  %s280_s26 = sand.u32 1, %s926_s13   ;;  %s251_s29 = scalar_lea.vmem [#allocation7], %s241_s6 }
  0x96   : > { %v583_v5 = vpack.c.bf16 %v285_v3, %v284_v2  ;;  %v586_v7 = vpack.c.bf16 %v287_v6, %v286_v4  ;;  %v283_v8 = vld [vmem:[%s234_s10] sm:$0xff]  ;;  %s1427_s3 = sld [smem:[#allocation13_spill]]  ;;  %s553_s20 = sshll.u32 %s280_s26, 5  ;;  %vm373_vm2 = vcmask 64512  }
  0x97   : > { %v554_v9 = vld [vmem:[%s251_s29] ss:$0 sm:$0xff]  ;;  %s984_s23 = smov 104   ;;  %s985_s18 = smov 120  }
  0x98   : > { %584 = vmatpush3.bf16.msra.mxu0 %v583_v5  ;;  %s282_s28 = scalar_lea.vmem [#allocation8], %s553_s20  ;;  %s986_s5 = smov 112  }
  0x99   : > { %585 = vmatprep.subr.bf16.mxu0 %v981_v0  ;;  %s408_s27 = sshll.u32 %s282_s28, 4  ;;  %s1428_s9 = sld [smem:[#allocation23_spill]]  ;;  %s1291_s27 = int_to_ptr.vmem [resolvable:$true] %s408_s27 }
  0x9a   : > { %p369_p11 = scmp.eq.s32.totalorder %s1426_s15, 0  ;;  %s561_s0 = sshll.u32 %s1426_s15, 3 }
  0x9b   : > { %s1301_s30 = scalar_lea.sflag [#allocation4], %s280_s26  ;;  %s824_s15 = scalar_lea.vmem %s1291_s27, 512 }
  0x9c   : > { %587 = vmatpush3.bf16.msra.mxu0 %v586_v7  ;;  %s370_s4 = scalar_select %p369_p11, 0.17677669, 1.0 }
  0x9d   : > { %s560_s21 = sshll.u32 %s1427_s3, 2  ;;  %p825_p6 = scmp.ne.s32.totalorder %s1291_s27, %s824_s15 }
  0x9e   : > { %v371_v11 = vstv %s370_s4  ;;  %s405_s1 = sadd.s32 %s561_s0, %s560_s21  ;;  %p1429_p1 = scmp.ne.s32.totalorder %s1414_s11, 0 }
  0x9f   : > { %580 = vmatmul.mubr.msk.f32.vlgmr.msra.gmra.mrb[0].mxu0 %vm295_vm1, %v283_v8  ;;  %s562_s10 = sshll.u32 %s405_s1, 7  ;;  %s987_s4 = smov [#allocation8]  }
  0xa0   : > { %s1296_s7 = scalar_lea.hbm %s1428_s9, %s562_s10  ;;  %p826_p3 = pnand %p825_p6, %p1429_p1 }
  0xa1   : > { %s828_s29 = sshll.u32 %s987_s4, 4  ;;  %s829_s29 = int_to_ptr.vmem [resolvable:$false] %s828_s29 }
  0xa2   : > { %p827_p13 = pneg %p826_p3  ;;  %s830_s3 = scalar_lea.vmem %s829_s29, 1024 }
  0xa3   : > { %p831_p8 = scmp.lt.s32.totalorder %s1291_s27, %s829_s29  ;;  %p832_p2 = scmp.lt.s32.totalorder %s830_s3, %s824_s15 }
  0xa5   : > { %p833_p12 = por %p832_p2, %p831_p8 }
  0xa7   : > { %p834_p4 = pnand %p833_p12, %p827_p13 }
 0x172   : > { %v365_v10 = vpop.f32.mrb[0].mxu0 }
 0x173   : > { %v366_v12 = vadd.f32 %v554_v9, %v365_v10  ;;  %v581_v13 = vpop.f32.mrb[1].mxu0 }
 0x175   : > { %v372_v14 = vmul.f32 %v371_v11, %v366_v12 }
 0x177   : > { %386 = vrot.lane.b32.xlu1 %v372_v14, %s984_s23  ;;  %376 = vrot.lane.b32.xlu0 %v372_v14, %s985_s18  ;;  %374 = vst.msk [vmem:[%s282_s28] sm:$0xff] %vm373_vm2, %v372_v14 }
 0x17b   : > { %381 = vrot.lane.b32.xlu0 %v372_v14, %s986_s5 }
 0x1e9   : > { %v387_v15 = vpop.permute.xlu1 %386  ;;  %v377_v16 = vpop.permute.xlu0 %376 }
 0x1ea   : > { %558 = vst.msk [vmem:[%s282_s28 + $0x18] sm:$0xff] %vm373_vm2, %v387_v15  ;;  %556 = vst.msk [vmem:[%s282_s28 + $0x8] sm:$0xff] %vm373_vm2, %v377_v16 }
 0x1ed   : > { %v382_v17 = vpop.permute.xlu0 %381 }
 0x1ee   : > { %557 = vst.msk [vmem:[%s282_s28 + $0x10] sm:$0xff] %vm373_vm2, %v382_v17 }
 0x1ef   : > { %837 = shalt.err (!%p834_p4)
}
 0x1f0   : > { %s838_s26 = scalar_lea.hbm %s1296_s7, 512  ;;  %s842_s18 = scalar_lea.hbm %s1428_s9, 3072 }
 0x1f1   : > { %p839_p0 = scmp.ne.s32.totalorder %s1296_s7, %s838_s26  ;;  %p843_p7 = scmp.lt.u32.totalorder %s1296_s7, %s1428_s9 }
 0x1f2   : > { %p844_p5 = scmp.lt.u32.totalorder %s842_s18, %s838_s26  ;;  %p846_p6 = scmp.lt.u32.totalorder %s838_s26, %s1296_s7 }
 0x1f3   : > { %p840_p10 = pnand %p839_p0, %p1429_p1 }
 0x1f4   : > { %p845_p11 = por %p844_p5, %p843_p7 }
 0x1f5   : > { %p841_p9 = pneg %p840_p10 }
 0x1f6   : > { %p847_p3 = por %p846_p6, %p845_p11 }
 0x1f8   : > { %p848_p13 = pnand %p847_p3, %p841_p9 }
 0x1fa   : > { %851 = shalt.err (!%p848_p13)
}
 0x1fb   : > { %s988_s21 = smov 128   ;;  %s989_s0 = smov 8  }
 0x1fc   : > { %594 = dma.vmem_to_hbm [thread:$0]  (%p1429_p1), %s1291_s27, 512, %s1296_s7, %s1301_s30, %s988_s21, %s988_s21, %s989_s0  }
 0x1fd PF: > { %p611_p8 = scmp.ge.s32.totalorder %s974_s25, 2  ;;  %s423_s1 = sand.u32 1, %s922_s12  }
 0x1fe   : > { %p1430_p2 = scmp.ne.s32.totalorder %s1416_s22, 0  ;;  %s424_s10 = scalar_lea.sflag [#allocation4], %s423_s1 }
 0x200   : > { %p607_p12 = pnand %p611_p8, %p1430_p2 }
 0x202   : > { %917 = dma.done.wait (!%p607_p12), %s424_s10, 512  }
 0x203   : > { %919 = vsyncadd (!%p607_p12), %s424_s10, 4294966784  ;;  %s22_s25 = sadd.s32 1, %s974_s25   ;;  %s1432_s11 = sld [smem:[#allocation20_spill]] }
 0x204   : > { %p1330_p4 = scmp.ge.s32.totalorder %s22_s25, 8   ;;  %s1433_s27 = sld [smem:[#allocation19_spill]] }
 0x205   : > { %s1434_s6 = sld [smem:[#allocation12_spill]]  ;;  %s1435_s20 = sld [smem:[#allocation18_spill]] }
 0x206   : > { %s1436_s21 = sld [smem:[#allocation15_spill]]  ;;  %s1437_s23 = sld [smem:[#allocation16_spill]] }
 0x207   : > { %s1438_s7 = sld [smem:[#allocation17_spill]]  ;;  %s1439_s12 = smov %s926_s13 }
 0x208   : > { %s1440_s13 = smov %s930_s14  ;;  %s1442_s15 = smov %s938_s16 }
 0x209   : > { %s1441_s14 = smov %s1432_s11  ;;  %s1443_s16 = smov %s942_s17 }
 0x20a   : > { %s1444_s17 = smov %s1433_s27  ;;  %s1445_s18 = smov %s950_s19 }
 0x20b   : > { %s1446_s19 = smov %s1434_s6  ;;  %s1447_s22 = smov %s970_s24 }
 0x20c   :  { %21 = sbr.rel (!%p1330_p4) target bundleno = 16 (0x10), region = 104 }
 0x20d   : > { %s1448_s24 = smov %s1438_s7 }
 0x213   :  { %429 = vsyncpa [#allocation3], 1 }
 0x214   :  { %431 = vsyncpa [#allocation3 + $0x1], 1 }
 0x215   :  { %432 = vsyncpa [#allocation6], 1 }
 0x216   :  { %434 = vsyncpa [#allocation6 + $0x1], 1 }
 0x217   :  { %435 = vsyncpa [#allocation4], 1 }
 0x218   :  { %437 = vsyncpa [#allocation4 + $0x1], 1 }

</bundles_post_ra>
